<compile_context>
chip_gen: v5e
topology: v5e:2x2
jax: 0.10.0
libtpu: 0.0.40
codegen_flags: <defaults>
</compile_context>

<pallas_src>
import math

import jax
import jax.numpy as jnp
from jax import lax
from jax.experimental import pallas as pl
from jax.experimental.pallas import tpu as pltpu

_SUB = 8      # f32 sublane tile
_LANES = 128  # lanes per vreg tile


def _round_up(v, m):
    return (v + m - 1) // m * m


def _make_partials_kernel(rows, t_rows, sub_rows, cpp, needs_mask):
    """Kernel computing per-(sample, split) partial sums of x*t, x, t."""
    n_sub = t_rows // sub_rows

    def kernel(x_ref, t_ref, acc_ref):
        # x_ref / t_ref: (1, t_rows, 128) blocks.
        # acc_ref:       (1, 1, 3, 8, 128) f32 block, resident across the
        #                innermost ("arbitrary") chunk axis.
        k = pl.program_id(2)

        @pl.when(k == 0)
        def _init():
            acc_ref[...] = jnp.zeros_like(acc_ref)

        chunk = pl.program_id(1) * cpp + k     # global chunk index
        row0 = chunk * t_rows                  # first global row of this block

        def body(s, carry):
            a_xt, a_x, a_t = carry
            off = s * sub_rows
            start = pl.multiple_of(off, sub_rows)
            x = x_ref[0, pl.ds(start, sub_rows), :].astype(jnp.float32)
            t = t_ref[0, pl.ds(start, sub_rows), :].astype(jnp.float32)
            if needs_mask:
                # Rows past `rows` come from the (undefined) out-of-bounds tail
                # of the last block; zero them before accumulating.
                rid = row0 + off + lax.broadcasted_iota(
                    jnp.int32, (sub_rows, _LANES), 0)
                valid = rid < rows
                x = jnp.where(valid, x, 0.0)
                t = jnp.where(valid, t, 0.0)
            # Tile-aligned reshape (free): keep the reduction sublane-preserving
            # so it is pure element-wise VPU adds (no XLU work per step).
            x3 = x.reshape(sub_rows // _SUB, _SUB, _LANES)
            t3 = t.reshape(sub_rows // _SUB, _SUB, _LANES)
            return (a_xt + jnp.sum(x3 * t3, axis=0),
                    a_x + jnp.sum(x3, axis=0),
                    a_t + jnp.sum(t3, axis=0))

        zero = jnp.zeros((_SUB, _LANES), jnp.float32)
        a_xt, a_x, a_t = lax.fori_loop(0, n_sub, body, (zero, zero, zero))

        acc_ref[0, 0, 0, :, :] += a_xt   # intersection partials
        acc_ref[0, 0, 1, :, :] += a_x    # sum(input) partials
        acc_ref[0, 0, 2, :, :] += a_t    # sum(target) partials

    return kernel


def dice_recall_loss(input_nchw, target_nchw, *, block_rows=4096, chunk_splits=1):
    """Matches dice_recall_loss.forward(input, target) -> scalar.

    `target_nchw` may be float32, bfloat16 or int8 (exact for {0,1} masks);
    lower-precision targets cut their HBM read traffic with no wrapper pass.
    `chunk_splits` > 1 splits the reduction axis into a second parallel grid
    axis (useful on v7x's two TensorCores when the batch is tiny).
    """
    n = target_nchw.shape[0]
    d = math.prod(target_nchw.shape[1:])

    x = input_nchw.reshape(n, d)
    t = target_nchw.reshape(n, d)

    rows = pl.cdiv(d, _LANES)
    lane_pad = rows * _LANES - d
    if lane_pad:
        # Only when C*H*W is not 128-aligned: pad the last lane-row (<=127
        # elements). Zeros are exact for all three sums.
        # TODO(synk): could be removed with 2-D (N, D) blocks + lane masking.
        x = jnp.pad(x, ((0, 0), (0, lane_pad)))
        t = jnp.pad(t, ((0, 0), (0, lane_pad)))

    x3 = x.reshape(n, rows, _LANES)   # metadata-only when lane_pad == 0
    t3 = t.reshape(n, rows, _LANES)

    block_rows = max(_SUB, _round_up(block_rows, _SUB))
    t_rows = min(block_rows, _round_up(rows, _SUB))
    sub_rows = next(c for c in (512, 256, 128, 64, 32, 16, 8) if t_rows % c == 0)
    num_chunks = pl.cdiv(rows, t_rows)
    needs_mask = (num_chunks * t_rows != rows)

    # Optional parallel split of the chunk axis (megacore when N is tiny).
    p = max(1, min(int(chunk_splits), num_chunks))
    while num_chunks % p:
        p -= 1
    cpp = num_chunks // p

    blk = (1, t_rows, _LANES)
    step_in_bytes = t_rows * _LANES * (x3.dtype.itemsize + t3.dtype.itemsize)
    # Double-buffered inputs + slack for in-kernel slab temporaries; explicit so
    # v5e's 16 MiB scoped default never silently gates larger blocks, capped
    # well under v7x's 64 MiB physical VMEM.
    vmem_limit = int(min(48 << 20, max(16 << 20, 2 * step_in_bytes + (12 << 20))))

    cost = pl.CostEstimate(
        flops=4 * n * rows * _LANES,
        transcendentals=0,
        bytes_accessed=(x3.size * x3.dtype.itemsize
                        + t3.size * t3.dtype.itemsize
                        + n * p * 3 * _SUB * _LANES * 4),
    )

    kernel = _make_partials_kernel(rows, t_rows, sub_rows, cpp, needs_mask)

    partials = pl.pallas_call(
        kernel,
        out_shape=jax.ShapeDtypeStruct((n, p, 3, _SUB, _LANES), jnp.float32),
        grid_spec=pltpu.PrefetchScalarGridSpec(
            num_scalar_prefetch=0,
            grid=(n, p, cpp),
            in_specs=[
                pl.BlockSpec(blk, lambda b, pp, k: (b, pp * cpp + k, 0)),
                pl.BlockSpec(blk, lambda b, pp, k: (b, pp * cpp + k, 0)),
            ],
            out_specs=pl.BlockSpec((1, 1, 3, _SUB, _LANES),
                                   lambda b, pp, k: (b, pp, 0, 0, 0)),
        ),
        compiler_params=pltpu.CompilerParams(
            dimension_semantics=("parallel", "parallel", "arbitrary"),
            vmem_limit_bytes=vmem_limit,
        ),
        cost_estimate=cost,
    )(x3, t3)

    # Tiny finalize in the wrapper: cross-lane sums + scalar loss math.
    stats = jnp.sum(partials, axis=(1, 3, 4))          # (N, 3)
    inter, isum, tsum = stats[:, 0], stats[:, 1], stats[:, 2]

    # recall_Loss: smooth = 0.2
    recall = (inter + 0.2) / (tsum + 0.2)
    loss_recall = 1.0 - jnp.sum(recall) / n

    # DiceLoss: smooth = 1; repo formulation 2*(inter + s)/(sum(x) + sum(t) + s).
    dice = 2.0 * (inter + 1.0) / (isum + tsum + 1.0)
    loss_dice = 1.0 - jnp.sum(dice) / n

    return 0.75 * loss_recall + 0.25 * loss_dice


def _reference_loss(input_nchw, target_nchw):
    # Pure-JAX reference mirroring the PyTorch module.
    n = target_nchw.shape[0]
    x = input_nchw.reshape(n, -1).astype(jnp.float32)
    t = target_nchw.reshape(n, -1).astype(jnp.float32)
    inter = jnp.sum(x * t, axis=1)
    recall = (inter + 0.2) / (jnp.sum(t, axis=1) + 0.2)
    loss1 = 1.0 - jnp.sum(recall) / n
    dice = 2.0 * (inter + 1.0) / (jnp.sum(x, axis=1) + jnp.sum(t, axis=1) + 1.0)
    loss2 = 1.0 - jnp.sum(dice) / n
    return 0.75 * loss1 + 0.25 * loss2


if __name__ == "__main__":
    key = jax.random.PRNGKey(0)
    k1, k2, k3, k4, k5, k6 = jax.random.split(key, 6)

    # 1) Main check: small NCHW shapes consistent with the module's forward.
    N, C, H, W = 2, 4, 16, 16
    pred = jax.nn.sigmoid(jax.random.normal(k1, (N, C, H, W), dtype=jnp.float32))
    target = (jax.random.uniform(k2, (N, C, H, W)) > 0.5).astype(jnp.float32)
    loss = jax.block_until_ready(dice_recall_loss(pred, target))
    ref = _reference_loss(pred, target)
    assert jnp.allclose(loss, ref, atol=1e-5, rtol=1e-5), (loss, ref)

    # 2) Ragged (non-128-aligned) spatial shape + bf16 target (produced
    #    directly as bf16 upstream -> half the target HBM read traffic).
    N2, C2, H2, W2 = 2, 3, 17, 19
    pred2 = jax.nn.sigmoid(jax.random.normal(k3, (N2, C2, H2, W2), dtype=jnp.float32))
    target2 = (jax.random.uniform(k4, (N2, C2, H2, W2)) > 0.5).astype(jnp.bfloat16)
    loss2 = jax.block_until_ready(dice_recall_loss(pred2, target2))
    ref2 = _reference_loss(pred2, target2)
    assert jnp.allclose(loss2, ref2, atol=1e-5, rtol=1e-5), (loss2, ref2)

    # 3) Multi-chunk accumulation + in-kernel tail masking (rows % block != 0)
    #    + int8 target + parallel chunk split (v7x megacore path).
    N3, C3, H3, W3 = 2, 2, 48, 80
    pred3 = jax.nn.sigmoid(jax.random.normal(k5, (N3, C3, H3, W3), dtype=jnp.float32))
    target3 = (jax.random.uniform(k6, (N3, C3, H3, W3)) > 0.5).astype(jnp.int8)
    loss3 = jax.block_until_ready(
        dice_recall_loss(pred3, target3, block_rows=32, chunk_splits=2))
    ref3 = _reference_loss(pred3, target3)
    assert jnp.allclose(loss3, ref3, atol=1e-5, rtol=1e-5), (loss3, ref3)

    print("KERNEL_OK")
</pallas_src>

<mosaic_0001>
module attributes {stable_mosaic.version = 11 : i64} {
  func.func @kernel(%arg0: i32, %arg1: i32, %arg2: i32, %arg3: memref<1x8x128xf32, #tpu.memory_space<vmem>>, %arg4: memref<1x8x128xf32, #tpu.memory_space<vmem>>, %arg5: memref<1x1x3x8x128xf32, #tpu.memory_space<vmem>>) attributes {dimension_semantics = [#tpu.dimension_semantics<parallel>, #tpu.dimension_semantics<parallel>, #tpu.dimension_semantics<arbitrary>], iteration_bounds = array<i64: 2, 1, 1>, scalar_prefetch = 0 : i64, scratch_operands = 0 : i64, tpu.core_type = #tpu.core_type<tc>, window_params = [{transform_indices = @transform_0, window_bounds = array<i64: 1, 8, 128>}, {transform_indices = @transform_1, window_bounds = array<i64: 1, 8, 128>}, {transform_indices = @transform_2, window_bounds = array<i64: 1, 1, 3, 8, 128>}]} {
    %c0_i32 = arith.constant 0 : i32
    %0 = arith.cmpi eq, %arg2, %c0_i32 : i32
    %1 = arith.extui %0 : i1 to i32
    %c0_i32_0 = arith.constant 0 : i32
    %2 = arith.cmpi ne, %1, %c0_i32_0 : i32
    scf.if %2 {
      %cst_36 = arith.constant 0.000000e+00 : f32
      %39 = vector.broadcast %cst_36 : f32 to vector<1x1x3x8x128xf32>
      %c0_37 = arith.constant 0 : index
      %c0_38 = arith.constant 0 : index
      %c0_39 = arith.constant 0 : index
      %c0_40 = arith.constant 0 : index
      %c0_41 = arith.constant 0 : index
      %40 = vector.load %arg5[%c0_37, %c0_38, %c0_39, %c0_40, %c0_41] : memref<1x1x3x8x128xf32, #tpu.memory_space<vmem>>, vector<1x1x3x8x128xf32>
      tpu.vector_store %arg5[%c0_37, %c0_38, %c0_39, %c0_40, %c0_41], %39 {strides = array<i32>} : memref<1x1x3x8x128xf32, #tpu.memory_space<vmem>>, vector<1x1x3x8x128xf32>,
    } else {
    }
    %cst = arith.constant 0.000000e+00 : f32
    %3 = vector.broadcast %cst : f32 to vector<8x128xf32>
    %c0_i32_1 = arith.constant 0 : i32
    %c8_i32 = arith.constant 8 : i32
    %4 = arith.muli %c0_i32_1, %c8_i32 : i32
    %5 = tpu.assume_multiple %4, 8 : i32
    %c0 = arith.constant 0 : index
    %6 = arith.index_cast %5 : i32 to index
    %c0_2 = arith.constant 0 : index
    %7 = vector.load %arg3[%c0, %6, %c0_2] : memref<1x8x128xf32, #tpu.memory_space<vmem>>, vector<1x8x128xf32>
    %8 = vector.shape_cast %7 : vector<1x8x128xf32> to vector<8x128xf32>
    %c0_3 = arith.constant 0 : index
    %9 = arith.index_cast %5 : i32 to index
    %c0_4 = arith.constant 0 : index
    %10 = vector.load %arg4[%c0_3, %9, %c0_4] : memref<1x8x128xf32, #tpu.memory_space<vmem>>, vector<1x8x128xf32>
    %11 = vector.shape_cast %10 : vector<1x8x128xf32> to vector<8x128xf32>
    %12 = vector.shape_cast %8 : vector<8x128xf32> to vector<1x8x128xf32>
    %13 = vector.shape_cast %11 : vector<8x128xf32> to vector<1x8x128xf32>
    %14 = arith.mulf %12, %13 : vector<1x8x128xf32>
    %cst_5 = arith.constant dense<0.000000e+00> : vector<8x128xf32>
    %15 = vector.multi_reduction <add>, %14, %cst_5 [0] : vector<1x8x128xf32> to vector<8x128xf32>
    %16 = arith.addf %3, %15 : vector<8x128xf32>
    %cst_6 = arith.constant dense<0.000000e+00> : vector<8x128xf32>
    %17 = vector.multi_reduction <add>, %12, %cst_6 [0] : vector<1x8x128xf32> to vector<8x128xf32>
    %18 = arith.addf %3, %17 : vector<8x128xf32>
    %cst_7 = arith.constant dense<0.000000e+00> : vector<8x128xf32>
    %19 = vector.multi_reduction <add>, %13, %cst_7 [0] : vector<1x8x128xf32> to vector<8x128xf32>
    %20 = arith.addf %3, %19 : vector<8x128xf32>
    %c1_i32 = arith.constant 1 : i32
    %c0_8 = arith.constant 0 : index
    %c0_9 = arith.constant 0 : index
    %c0_10 = arith.constant 0 : index
    %c0_11 = arith.constant 0 : index
    %c0_12 = arith.constant 0 : index
    %21 = vector.load %arg5[%c0_8, %c0_9, %c0_10, %c0_11, %c0_12] : memref<1x1x3x8x128xf32, #tpu.memory_space<vmem>>, vector<1x1x1x8x128xf32>
    %22 = vector.shape_cast %21 : vector<1x1x1x8x128xf32> to vector<8x128xf32>
    %23 = arith.addf %22, %16 : vector<8x128xf32>
    %c0_13 = arith.constant 0 : index
    %c0_14 = arith.constant 0 : index
    %c0_15 = arith.constant 0 : index
    %c0_16 = arith.constant 0 : index
    %c0_17 = arith.constant 0 : index
    %24 = vector.load %arg5[%c0_13, %c0_14, %c0_15, %c0_16, %c0_17] : memref<1x1x3x8x128xf32, #tpu.memory_space<vmem>>, vector<1x1x1x8x128xf32>
    %25 = vector.shape_cast %24 : vector<1x1x1x8x128xf32> to vector<8x128xf32>
    %26 = vector.shape_cast %23 : vector<8x128xf32> to vector<1x1x1x8x128xf32>
    tpu.vector_store %arg5[%c0_13, %c0_14, %c0_15, %c0_16, %c0_17], %26 {strides = array<i32>} : memref<1x1x3x8x128xf32, #tpu.memory_space<vmem>>, vector<1x1x1x8x128xf32>,
    %c0_18 = arith.constant 0 : index
    %c0_19 = arith.constant 0 : index
    %c1 = arith.constant 1 : index
    %c0_20 = arith.constant 0 : index
    %c0_21 = arith.constant 0 : index
    %27 = vector.load %arg5[%c0_18, %c0_19, %c1, %c0_20, %c0_21] : memref<1x1x3x8x128xf32, #tpu.memory_space<vmem>>, vector<1x1x1x8x128xf32>
    %28 = vector.shape_cast %27 : vector<1x1x1x8x128xf32> to vector<8x128xf32>
    %29 = arith.addf %28, %18 : vector<8x128xf32>
    %c0_22 = arith.constant 0 : index
    %c0_23 = arith.constant 0 : index
    %c1_24 = arith.constant 1 : index
    %c0_25 = arith.constant 0 : index
    %c0_26 = arith.constant 0 : index
    %30 = vector.load %arg5[%c0_22, %c0_23, %c1_24, %c0_25, %c0_26] : memref<1x1x3x8x128xf32, #tpu.memory_space<vmem>>, vector<1x1x1x8x128xf32>
    %31 = vector.shape_cast %30 : vector<1x1x1x8x128xf32> to vector<8x128xf32>
    %32 = vector.shape_cast %29 : vector<8x128xf32> to vector<1x1x1x8x128xf32>
    tpu.vector_store %arg5[%c0_22, %c0_23, %c1_24, %c0_25, %c0_26], %32 {strides = array<i32>} : memref<1x1x3x8x128xf32, #tpu.memory_space<vmem>>, vector<1x1x1x8x128xf32>,
    %c0_27 = arith.constant 0 : index
    %c0_28 = arith.constant 0 : index
    %c2 = arith.constant 2 : index
    %c0_29 = arith.constant 0 : index
    %c0_30 = arith.constant 0 : index
    %33 = vector.load %arg5[%c0_27, %c0_28, %c2, %c0_29, %c0_30] : memref<1x1x3x8x128xf32, #tpu.memory_space<vmem>>, vector<1x1x1x8x128xf32>
    %34 = vector.shape_cast %33 : vector<1x1x1x8x128xf32> to vector<8x128xf32>
    %35 = arith.addf %34, %20 : vector<8x128xf32>
    %c0_31 = arith.constant 0 : index
    %c0_32 = arith.constant 0 : index
    %c2_33 = arith.constant 2 : index
    %c0_34 = arith.constant 0 : index
    %c0_35 = arith.constant 0 : index
    %36 = vector.load %arg5[%c0_31, %c0_32, %c2_33, %c0_34, %c0_35] : memref<1x1x3x8x128xf32, #tpu.memory_space<vmem>>, vector<1x1x1x8x128xf32>
    %37 = vector.shape_cast %36 : vector<1x1x1x8x128xf32> to vector<8x128xf32>
    %38 = vector.shape_cast %35 : vector<8x128xf32> to vector<1x1x1x8x128xf32>
    tpu.vector_store %arg5[%c0_31, %c0_32, %c2_33, %c0_34, %c0_35], %38 {strides = array<i32>} : memref<1x1x3x8x128xf32, #tpu.memory_space<vmem>>, vector<1x1x1x8x128xf32>,
    return
  }
  func.func @transform_0(%arg0: i32, %arg1: i32, %arg2: i32) -> (i32, i32, i32) {
    %c1_i32 = arith.constant 1 : i32
    %0 = arith.muli %arg1, %c1_i32 : i32
    %1 = arith.addi %0, %arg2 : i32
    %c0_i32 = arith.constant 0 : i32
    %c0_i32_0 = arith.constant 0 : i32
    return %arg0, %1, %c0_i32 : i32, i32, i32
  }
  func.func @transform_1(%arg0: i32, %arg1: i32, %arg2: i32) -> (i32, i32, i32) {
    %c1_i32 = arith.constant 1 : i32
    %0 = arith.muli %arg1, %c1_i32 : i32
    %1 = arith.addi %0, %arg2 : i32
    %c0_i32 = arith.constant 0 : i32
    %c0_i32_0 = arith.constant 0 : i32
    return %arg0, %1, %c0_i32 : i32, i32, i32
  }
  func.func @transform_2(%arg0: i32, %arg1: i32, %arg2: i32) -> (i32, i32, i32, i32, i32) {
    %c0_i32 = arith.constant 0 : i32
    %c0_i32_0 = arith.constant 0 : i32
    %c0_i32_1 = arith.constant 0 : i32
    %c0_i32_2 = arith.constant 0 : i32
    return %arg0, %arg1, %c0_i32, %c0_i32_0, %c0_i32_1 : i32, i32, i32, i32, i32
  }
}

</mosaic_0001>

<bundles_post_ra>
// kernel: tpu_custom_call.1
= control target key start
LH: loop header
LB: loop body
LE: loop exit
PB: predicated region body
PF: predicated region fallthrough
CT: control target
= control target key end

     0   :  { %7 = vsyncpa [#allocation3], 0  ;;  %s778_s0 = inlined_call_operand.hbm [shape: f32[2,8,128], index: 0, kind: input, shape index: {}]   ;;  %s779_s1 = inlined_call_operand.hbm [shape: f32[2,8,128], index: 1, kind: input, shape index: {}]   ;;  %s780_s2 = inlined_call_operand.hbm [shape: f32[2,1,3,8,128], index: 2, kind: output, shape index: {}]  }
   0x1   :  { %9 = vsyncpa [#allocation3 + $0x1], 0 }
   0x2   :  { %10 = vsyncpa [#allocation6], 0 }
   0x3   :  { %12 = vsyncpa [#allocation6 + $0x1], 0 }
   0x4   :  { %13 = vsyncpa [#allocation4], 0 }
   0x5   :  { %15 = vsyncpa [#allocation4 + $0x1], 0  ;;  %s649_s9 = smov 0   ;;  %s651_s10 = smov 0  }
   0x6   :  { %s653_s11 = smov 0   ;;  %s655_s12 = smov 0  }
   0x7   :  { %s657_s13 = smov 0   ;;  %s659_s14 = smov 0  }
   0x8 LB: > { %s394_s15 = sadd.s32 4294967295, %s630_s14   ;;  %s395_s16 = sadd.s32 4294967294, %s630_s14   ;;  %s630_s14 = sphi %s659_s14, %s21_s14   ;;  %s626_s13 = sphi %s657_s13, %s789_s13   ;;  %s622_s12 = sphi %s655_s12, %s788_s12   ;;  %s618_s11 = sphi %s653_s11, %s787_s11   ;;  %s614_s10 = sphi %s651_s10, %s786_s10   ;;  %s610_s9 = sphi %s649_s9, %s785_s9  }
   0x9   : > { %s40_s17 = sadd.s32 1, %s626_s13  ;;  %s51_s18 = sadd.s32 1, %s618_s11 }
   0xa   : > { %p42_p0 = scmp.ge.s32.totalorder %s40_s17, 2  ;;  %p58_p1 = scmp.ne.s32.totalorder %s618_s11, %s614_s10 }
   0xb   : > { %p59_p2 = scmp.eq.s32.totalorder %s630_s14, 0  ;;  %p64_p3 = scmp.ne.s32.totalorder %s614_s10, %s610_s9 }
   0xc   : > { %s791_s17 = smov (%p42_p0, %s40_s17), 0  ;;  %p65_p5 = scmp.eq.s32.totalorder %s394_s15, 0 }
   0xd   : > { %p690_p4 = por %p59_p2, %p58_p1  ;;  %s46_s20 = ssub.s32 %s626_s13, %s791_s17 }
   0xe   : > { %p120_p6 = scmp.eq.s32.totalorder %s394_s15, 1  ;;  %p49_p7 = scmp.eq.s32.totalorder %s46_s20, 0 }
   0xf   : > { %p696_p8 = por %p65_p5, %p64_p3  ;;  %p126_p10 = scmp.eq.s32.totalorder %s395_s16, 1 }
  0x10   : > { %p700_p9 = por %p120_p6, %p58_p1  ;;  %p397_p12 = scmp.ge.s32.totalorder %s630_s14, 2 }
  0x11   : > { %s705_s23 = scalar_select %p49_p7, %s618_s11, %s51_s18  }
  0x12   : > { %p707_p11 = por %p126_p10, %p64_p3  ;;  %p431_p13 = scmp.lt.s32.totalorder %s630_s14, 2 }
  0x13   : > { %s146_s25 = sand.u32 1, %s618_s11   ;;  %s399_s27 = sshll.u32 %s626_s13, 3 }
  0x14   : > { %s398_s26 = sshll.u32 %s146_s25, 3  ;;  %s156_s30 = scalar_lea.hbm %s778_s0, %s399_s27 }
  0x15   : > { %s150_s3 = scalar_lea.vmem [#allocation2], %s398_s26  ;;  %s158_s5 = sshll.u32 %s156_s30, 4  ;;  %s159_s5 = int_to_ptr.hbm [resolvable:$true] %s158_s5 }
  0x16   : > { %s160_s4 = sshll.u32 %s150_s3, 4  ;;  %p421_p0 = pnand %p431_p13, %p690_p4  ;;  %s161_s4 = int_to_ptr.vmem [resolvable:$true] %s160_s4 }
  0x17   : > { %p402_p1 = scmp.ge.s32.totalorder %s630_s14, 1  ;;  %p186_p2 = scmp.lt.s32.totalorder %s630_s14, 3 }
  0x18   : > { %s147_s6 = scalar_lea.sflag [#allocation3], %s146_s25  ;;  %s177_s15 = scalar_lea.hbm %s779_s1, %s399_s27 }
  0x19   : > { %423 = dma.hbm_to_vmem [thread:$0]  (!%p421_p0), %s159_s5, 128, %s161_s4, %s147_s6  }
  0x1a   : > { %p187_p3 = pnand %p402_p1, %p186_p2  ;;  %s171_s16 = scalar_lea.vmem [#allocation5], %s398_s26 }
  0x1b   : > { %s181_s18 = sshll.u32 %s171_s16, 4  ;;  %s179_s20 = sshll.u32 %s177_s15, 4  ;;  %s182_s18 = int_to_ptr.vmem [resolvable:$true] %s181_s18  ;;  %s180_s20 = int_to_ptr.hbm [resolvable:$true] %s179_s20 }
  0x1c   : > { %s168_s28 = scalar_lea.sflag [#allocation6], %s146_s25  ;;  %190 = sbr.rel (%p187_p3) target bundleno = 54 (0x36), region = 28 }
  0x1d   : > { %426 = dma.hbm_to_vmem [thread:$0]  (!%p421_p0), %s180_s20, 128, %s182_s18, %s168_s28  }
  0x1e   : > { %s726_s19 = sand.u32 (!%p187_p3), 1, %s614_s10  }
  0x1f   : > { %s403_s29 = sshll.u32 (!%p187_p3), %s726_s19, 3  ;;  %s193_s30 = scalar_lea.sflag (!%p187_p3), [#allocation3], %s726_s19 }
  0x20   : > { %s196_s3 = scalar_lea.vmem (!%p187_p3), [#allocation2], %s403_s29 }
  0x21   : > { %597 = dma.done.wait (%p696_p8), %s193_s30, 128  }
  0x22   : > { %599 = vsyncadd (%p696_p8), %s193_s30, 4294967168  ;;  %s203_s26 = scalar_lea.sflag [#allocation6], %s726_s19  ;;  %s206_s25 = scalar_lea.vmem [#allocation5], %s403_s29 }
  0x23   : > { %601 = dma.done.wait (%p696_p8), %s203_s26, 128  }
  0x24   : > { %603 = vsyncadd (%p696_p8), %s203_s26, 4294967168  ;;  %s412_s27 = smul.u32 24, %s726_s19  ;;  %v242_v0 = vld [vmem:[%s196_s3] sm:$0xff]  ;;  %v243_v1 = vld [vmem:[%s206_s25] sm:$0xff]  ;;  %s263_s21 = scalar_lea.sflag [#allocation4], %s726_s19 }
  0x25   : > { %s413_s4 = smul.u32 24, %s622_s12  ;;  %v244_v2 = vmul.f32 %v243_v1, %v242_v0  ;;  %s564_s29 = scalar_lea.hbm %s780_s2, 48 }
  0x26   : > { %s232_s8 = scalar_lea.vmem [#allocation7], %s412_s27 }
  0x27   : > { %s276_s7 = scalar_lea.hbm %s780_s2, %s413_s4  ;;  %s277_s15 = sshll.u32 %s232_s8, 4  ;;  %406 = vst [vmem:[%s232_s8 + $0x8] sm:$0xff] %v242_v0  ;;  %s278_s15 = int_to_ptr.vmem [resolvable:$true] %s277_s15 }
  0x28   : > { %s279_s16 = sshll.u32 %s276_s7, 4  ;;  %408 = vst [vmem:[%s232_s8 + $0x10] sm:$0xff] %v243_v1  ;;  %s280_s16 = int_to_ptr.hbm [resolvable:$true] %s279_s16 }
  0x29   : > { %253 = vst [vmem:[%s232_s8] sm:$0xff] %v244_v2  ;;  %s558_s18 = sshra.s32 %s280_s16, 4  ;;  %s559_s18 = int_to_ptr.hbm [resolvable:$true] %s558_s18 }
  0x2a   : > { %s560_s12 = scalar_lea.hbm %s559_s18, 24  ;;  %p565_p7 = scmp.lt.s32.totalorder %s559_s18, %s780_s2 }
  0x2b   : > { %p561_p4 = scmp.ne.s32.totalorder %s559_s18, %s560_s12  ;;  %p566_p8 = scmp.lt.s32.totalorder %s564_s29, %s560_s12 }
  0x2d   : > { %p562_p5 = pnand %p561_p4, %p700_p9  ;;  %p567_p10 = por %p566_p8, %p565_p7 }
  0x2f   : > { %p563_p6 = pneg %p562_p5 }
  0x31   : > { %p568_p13 = pnand %p567_p10, %p563_p6 }
  0x33   : > { %571 = shalt.err (!%p568_p13)
}
  0x34   : > { %s632_s19 = smov 128   ;;  %s633_s26 = smov 8  }
  0x35   : > { %418 = dma.vmem_to_hbm [thread:$0]  (%p700_p9), %s278_s15, 384, %s280_s16, %s263_s21, %s632_s19, %s632_s19, %s633_s26  }
  0x36 PF: > { %s294_s25 = sand.u32 1, %s610_s9   ;;  %p428_p0 = pnand %p397_p12, %p707_p11 }
  0x37   : > { %s295_s27 = scalar_lea.sflag [#allocation4], %s294_s25 }
  0x38   : > { %p429_p1 = pneg %p428_p0 }
  0x3a   : > { %605 = dma.done.wait (%p429_p1), %s295_s27, 384  }
  0x3b   : > { %607 = vsyncadd (%p429_p1), %s295_s27, 4294966912  ;;  %s21_s14 = sadd.s32 1, %s630_s14   ;;  %s785_s9 = smov %s614_s10 }
  0x3c   : > { %p18_p2 = scmp.ge.s32.totalorder %s21_s14, 4   ;;  %s786_s10 = smov %s618_s11 }
  0x3d   : > { %s787_s11 = smov %s705_s23  ;;  %s788_s12 = smov %s626_s13 }
  0x3e   : > { %s789_s13 = smov %s791_s17  ;;  %20 = sbr.rel (!%p18_p2) target bundleno = 8 (0x8), region = 92 }
  0x43   :  { %301 = vsyncpa [#allocation3], 1 }
  0x44   :  { %303 = vsyncpa [#allocation3 + $0x1], 1 }
  0x45   :  { %304 = vsyncpa [#allocation6], 1 }
  0x46   :  { %306 = vsyncpa [#allocation6 + $0x1], 1 }
  0x47   :  { %307 = vsyncpa [#allocation4], 1 }
  0x48   :  { %309 = vsyncpa [#allocation4 + $0x1], 1 }

</bundles_post_ra>
